<compile_context>
chip_gen: v6e
topology: v6e:2x2x1
jax: 0.10.0
libtpu: 0.0.40
codegen_flags: <defaults>
</compile_context>

<pallas_src>
import jax
import jax.numpy as jnp
from jax.experimental import pallas as pl
from jax.experimental.pallas import tpu as pltpu


def _sublane_pack(dtype) -> int:
    """Sublane packing factor for a dtype: 8 for f32, 16 for bf16, 32 for int8/fp8."""
    return max(8, 32 // max(1, jnp.dtype(dtype).itemsize))


def _attention_pool_kernel(x_ref, w_ref, o_ref):
    tb, n, d = x_ref.shape
    x = x_ref[...]            # (TB, N, D), kept in its input dtype for the MXU
    w = w_ref[...]            # (D, D)

    # Single large MXU call: (TB*N, D) x (D, D) with f32 accumulation, but only
    # when merging TB into the sublane axis does not cross packed-sublane tiles.
    if n % _sublane_pack(x_ref.dtype) == 0:
        logits = jnp.dot(
            x.reshape(tb * n, d), w,
            preferred_element_type=jnp.float32,
        ).reshape(tb, n, d)
    else:
        logits = jax.lax.dot_general(
            x, w,
            dimension_numbers=(((2,), (0,)), ((), ())),
            preferred_element_type=jnp.float32,
        )

    # Max-stabilized softmax over the sequence axis (PyTorch dim=-2 -> axis 1),
    # all math in f32.  The normalization is deferred: we pool the un-normalized
    # exp weights and divide the (TB, D) result once, exactly.
    m = jnp.max(logits, axis=1, keepdims=True)              # (TB, 1, D)
    e = jnp.exp(logits - m)                                  # (TB, N, D)
    denom = jnp.sum(e, axis=1)                               # (TB, D)
    num = jnp.sum(x.astype(jnp.float32) * e, axis=1)         # (TB, D)
    o_ref[...] = (num / denom).astype(o_ref.dtype)


def _choose_tb(B: int, N: int, D: int, x_itemsize: int, out_pack: int,
               tile_budget: int) -> int | None:
    """Largest divisor of B that is sublane-aligned (or == B), fits the VMEM
    tile budget, and (when possible) leaves a >= 4-step grid for pipelining."""
    row_bytes = N * D * x_itemsize
    # Per batch row: double-buffered x input tile + f32 temporaries (logits, e,
    # and the f32 upcast of x inside the weighted sum).
    per_row = 2 * row_bytes + 3 * N * D * 4
    tb_cap = max(1, tile_budget // per_row)

    cands = set()
    i = 1
    while i * i <= B:
        if B % i == 0:
            for d_ in (i, B // i):
                if d_ <= tb_cap and (d_ == B or d_ % out_pack == 0):
                    cands.add(d_)
        i += 1
    if not cands:
        return None

    min_tile_bytes = 1 << 20   # ~1 MiB x tile keeps the ~0.35us/step overhead small
    multi = [d_ for d_ in cands if B // d_ >= 4 and d_ * row_bytes >= min_tile_bytes]
    if multi:
        return max(multi)      # biggest tiles that still give a >= 4-step pipeline
    return max(cands)          # otherwise the biggest aligned divisor (possibly B)


def attention_pool(x: jax.Array, w: jax.Array, *, tb: int | None = None) -> jax.Array:
    """x: (B, N, D), w: (D, D) -> (B, D) (or (D,) when B == 1, matching squeeze)."""
    B, N, D = x.shape
    assert w.shape == (D, D), w.shape
    x_item = jnp.dtype(x.dtype).itemsize
    w_item = jnp.dtype(w.dtype).itemsize
    out_pack = _sublane_pack(x.dtype)

    # Generation-aware VMEM budget (v5e/v6e: 128 MiB, v7x: 64 MiB per TC).
    try:
        vmem_cap = int(pltpu.get_tpu_info().vmem_capacity_bytes)
    except Exception:
        vmem_cap = 64 * 1024 * 1024
    vmem_limit = min((vmem_cap * 3) // 4, 96 * 1024 * 1024)
    # Reserve the double-buffered (D, D) W block + headroom; the rest is the
    # per-step x tile + in-kernel f32 temporaries.
    # TODO(synk): for very large D, single-buffer W (pl.Buffered(1), constant
    # index map) or lane-tile W and the output to cut the 2*D*D footprint.
    reserved = 2 * D * D * w_item + (1 << 20)
    tile_budget = max(256 * 1024, vmem_limit - reserved)

    if tb is None:
        tb = _choose_tb(B, N, D, x_item, out_pack, tile_budget)
        if tb is None:
            # Rare fallback: no aligned divisor of B fits — use a sublane-aligned
            # tb and pad the batch (only the pad rows cost an extra HBM pass).
            per_row = 2 * N * D * x_item + 3 * N * D * 4
            tb_cap = max(1, tile_budget // per_row)
            tb = max(out_pack, (tb_cap // out_pack) * out_pack)
            tb = min(tb, ((B + out_pack - 1) // out_pack) * out_pack)

    grid_b = pl.cdiv(B, tb)
    Bp = grid_b * tb
    xp = x
    if Bp != B:
        xp = jnp.concatenate([x, jnp.zeros((Bp - B, N, D), x.dtype)], axis=0)

    cost = pl.CostEstimate(
        flops=2 * B * N * D * D,
        transcendentals=B * N * D,
        bytes_accessed=B * N * D * x_item + D * D * w_item + B * D * x_item,
    )

    out = pl.pallas_call(
        _attention_pool_kernel,
        out_shape=jax.ShapeDtypeStruct((Bp, D), x.dtype),
        grid_spec=pltpu.PrefetchScalarGridSpec(
            num_scalar_prefetch=0,
            grid=(grid_b,),
            in_specs=[
                pl.BlockSpec((tb, N, D), lambda b: (b, 0, 0)),
                # Constant index map: W is DMA'd once, not per batch step.
                pl.BlockSpec((D, D), lambda b: (0, 0)),
            ],
            out_specs=pl.BlockSpec((tb, D), lambda b: (b, 0)),
        ),
        compiler_params=pltpu.CompilerParams(
            dimension_semantics=("parallel",),   # megacore-shard the batch axis (v7x)
            vmem_limit_bytes=int(vmem_limit),
        ),
        cost_estimate=cost,
    )(xp, w)

    out = out[:B]
    if B == 1:
        out = out[0]  # match PyTorch squeeze(dim=-2) for batch size 1
    return out


def attention_pool_reference(x: jax.Array, w: jax.Array) -> jax.Array:
    logits = jnp.einsum("bnd,de->bne", x, w)
    attn = jax.nn.softmax(logits, axis=-2)
    out = jnp.sum(x * attn, axis=-2)
    return out[0] if x.shape[0] == 1 else out


if __name__ == "__main__":
    B, N, D = 2, 8, 32

    key = jax.random.PRNGKey(0)
    x = jax.random.normal(key, (B, N, D), dtype=jnp.float32)

    # Parameter init exactly as the module's __init__: identity matrix (dim, dim).
    w = jnp.eye(D, dtype=jnp.float32)

    out = jax.block_until_ready(attention_pool(x, w))

    ref = attention_pool_reference(x, w)
    assert out.shape == (B, D), out.shape
    assert jnp.allclose(out, ref, atol=1e-5, rtol=1e-5), float(jnp.max(jnp.abs(out - ref)))

    print("KERNEL_OK")
</pallas_src>

<mosaic_0001>
module attributes {stable_mosaic.version = 11 : i64} {
  func.func @_attention_pool_kernel(%arg0: i32, %arg1: memref<2x8x32xf32, #tpu.memory_space<vmem>>, %arg2: memref<32x32xf32, #tpu.memory_space<vmem>>, %arg3: memref<2x32xf32, #tpu.memory_space<vmem>>) attributes {dimension_semantics = [#tpu.dimension_semantics<parallel>], iteration_bounds = array<i64: 1>, scalar_prefetch = 0 : i64, scratch_operands = 0 : i64, tpu.core_type = #tpu.core_type<tc>, window_params = [{transform_indices = @transform_0, window_bounds = array<i64: 2, 8, 32>}, {pipeline_mode = #tpu.pipeline_mode<synchronous>, transform_indices = @transform_1, window_bounds = array<i64: 32, 32>}, {transform_indices = @transform_2, window_bounds = array<i64: 2, 32>}]} {
    %c0 = arith.constant 0 : index
    %c0_0 = arith.constant 0 : index
    %c0_1 = arith.constant 0 : index
    %0 = vector.load %arg1[%c0, %c0_0, %c0_1] : memref<2x8x32xf32, #tpu.memory_space<vmem>>, vector<2x8x32xf32>
    %c0_2 = arith.constant 0 : index
    %c0_3 = arith.constant 0 : index
    %1 = vector.load %arg2[%c0_2, %c0_3] : memref<32x32xf32, #tpu.memory_space<vmem>>, vector<32x32xf32>
    %2 = vector.shape_cast %0 : vector<2x8x32xf32> to vector<16x32xf32>
    %cst = arith.constant dense<0.000000e+00> : vector<16x32xf32>
    %3 = tpu.matmul %2, %1, %cst {dimension_numbers = #tpu.dot_dimension_numbers<[1], [0], [0], [1], [0, 0, 1, 1], [], []>} : vector<16x32xf32>, vector<32x32xf32>, vector<16x32xf32> -> vector<16x32xf32>
    %4 = vector.shape_cast %3 : vector<16x32xf32> to vector<2x8x32xf32>
    %cst_4 = arith.constant dense<0xFF800000> : vector<2x32xf32>
    %5 = vector.multi_reduction <maximumf>, %4, %cst_4 [1] : vector<2x8x32xf32> to vector<2x32xf32>
    %6 = vector.shape_cast %5 : vector<2x32xf32> to vector<2x1x32xf32>
    %7 = vector.broadcast %6 : vector<2x1x32xf32> to vector<2x8x32xf32>
    %8 = arith.subf %4, %7 : vector<2x8x32xf32>
    %9 = math.exp %8 : vector<2x8x32xf32>
    %cst_5 = arith.constant dense<0.000000e+00> : vector<2x32xf32>
    %10 = vector.multi_reduction <add>, %9, %cst_5 [1] : vector<2x8x32xf32> to vector<2x32xf32>
    %11 = arith.mulf %0, %9 : vector<2x8x32xf32>
    %cst_6 = arith.constant dense<0.000000e+00> : vector<2x32xf32>
    %12 = vector.multi_reduction <add>, %11, %cst_6 [1] : vector<2x8x32xf32> to vector<2x32xf32>
    %13 = arith.divf %12, %10 : vector<2x32xf32>
    %c0_7 = arith.constant 0 : index
    %c0_8 = arith.constant 0 : index
    %14 = vector.load %arg3[%c0_7, %c0_8] : memref<2x32xf32, #tpu.memory_space<vmem>>, vector<2x32xf32>
    tpu.vector_store %arg3[%c0_7, %c0_8], %13 {strides = array<i32>} : memref<2x32xf32, #tpu.memory_space<vmem>>, vector<2x32xf32>,
    return
  }
  func.func @transform_0(%arg0: i32) -> (i32, i32, i32) {
    %c0_i32 = arith.constant 0 : i32
    %c0_i32_0 = arith.constant 0 : i32
    %c0_i32_1 = arith.constant 0 : i32
    return %arg0, %c0_i32, %c0_i32_0 : i32, i32, i32
  }
  func.func @transform_1(%arg0: i32) -> (i32, i32) {
    %c0_i32 = arith.constant 0 : i32
    %c0_i32_0 = arith.constant 0 : i32
    %c0_i32_1 = arith.constant 0 : i32
    return %c0_i32, %c0_i32_0 : i32, i32
  }
  func.func @transform_2(%arg0: i32) -> (i32, i32) {
    %c0_i32 = arith.constant 0 : i32
    %c0_i32_0 = arith.constant 0 : i32
    return %arg0, %c0_i32 : i32, i32
  }
}

</mosaic_0001>

<bundles_post_ra>
// kernel: tpu_custom_call.1
= control target key start
LH: loop header
LB: loop body
LE: loop exit
PB: predicated region body
PF: predicated region fallthrough
CT: control target
= control target key end

     0   :  { %7 = vsyncpa [#allocation3], 0  ;;  %s340_s0 = inlined_call_operand.hbm [shape: f32[2,8,32], index: 0, kind: input, shape index: {}]   ;;  %s341_s1 = inlined_call_operand.hbm [shape: f32[32,32], index: 1, kind: input, shape index: {}]   ;;  %s342_s2 = inlined_call_operand.hbm [shape: f32[2,32], index: 2, kind: output, shape index: {}]  }
   0x1   :  { %8 = vsyncpa [#allocation6], 0 }
   0x2   :  { %9 = vsyncpa [#allocation4], 0  ;;  %s303_s9 = smov [#allocation2]  }
   0x3   :  { %s15_s10 = sshll.u32 %s303_s9, 4  ;;  %s16_s10 = int_to_ptr.vmem [resolvable:$true] %s15_s10 }
   0x4   :  { %s245_s11 = scalar_lea.vmem %s16_s10, 256  ;;  %p250_p1 = scmp.lt.s32.totalorder %s16_s10, %s16_s10 }
   0x5   :  { %p246_p0 = scmp.ne.s32.totalorder %s16_s10, %s245_s11  ;;  %p251_p2 = scmp.lt.s32.totalorder %s245_s11, %s245_s11 }
   0x7   :  { %p252_p3 = por %p251_p2, %p250_p1 }
   0x9   :  { %p253_p4 = pnand %p252_p3, %p246_p0 }
   0xb   :  { %256 = shalt.err (!%p253_p4)
}
   0xc   :  { %s304_s12 = smov 128   ;;  %s305_s13 = smov 8  }
   0xd   :  { %21 = dma.hbm_to_vmem [thread:$0]  %s340_s0, 256, %s16_s10, [#allocation3], %s304_s12, %s304_s12, %s305_s13  }
   0xe   :  { %s306_s16 = smov [#allocation5]  }
   0xf   :  { %s27_s17 = sshll.u32 %s306_s16, 4  ;;  %s28_s17 = int_to_ptr.vmem [resolvable:$true] %s27_s17 }
  0x10   :  { %s265_s18 = scalar_lea.vmem %s28_s17, 512  ;;  %p270_p6 = scmp.lt.s32.totalorder %s28_s17, %s28_s17 }
  0x11   :  { %p266_p5 = scmp.ne.s32.totalorder %s28_s17, %s265_s18  ;;  %p271_p7 = scmp.lt.s32.totalorder %s265_s18, %s265_s18 }
  0x13   :  { %p272_p8 = por %p271_p7, %p270_p6 }
  0x15   :  { %p273_p9 = pnand %p272_p8, %p266_p5 }
  0x17   :  { %276 = shalt.err (!%p273_p9)
}
  0x18   :  { %33 = dma.hbm_to_vmem [thread:$0]  %s341_s1, 512, %s28_s17, [#allocation6], %s304_s12, %s304_s12, %s305_s13  }
  0x19   :  { %297 = dma.done.wait [#allocation3], 256  }
  0x1a   :  { %298 = vsyncadd [#allocation3], 4294967040 }
  0x1b   :  { %299 = dma.done.wait [#allocation6], 512  }
  0x1c   :  { %300 = vsyncadd [#allocation6], 4294966784  ;;  %vm46_vm0 = vcmask 261120   ;;  %v45_v0 = vld [vmem:[#allocation5 + $0x18] sm:$0xff]  ;;  %v44_v1 = vld [vmem:[#allocation5 + $0x10] sm:$0xff]  ;;  %s307_s0 = smov [#allocation7]  }
  0x1d   :  { %213 = vmatprep.subr.mxu0 %v45_v0  ;;  %v40_v2 = vld [vmem:[#allocation2] sm:$0xff]  ;;  %v43_v3 = vld [vmem:[#allocation5 + $0x8] sm:$0xff]  ;;  %v42_v4 = vld [vmem:[#allocation5] sm:$0xff]  ;;  %s195_s1 = sshll.u32 %s307_s0, 4  ;;  %vm184_vm1 = vcmask 1041409   ;;  %vm187_vm2 = vcmask 254976   ;;  %s196_s1 = int_to_ptr.vmem [resolvable:$true] %s195_s1 }
  0x1e   :  { %214 = vmatpush3.msra.mxu0 %v45_v0  ;;  %221 = vmatprep.mubr.msk.f32.mxu0 %vm46_vm0, %v40_v2  ;;  %v41_v5 = vld [vmem:[#allocation2 + $0x8] sm:$0xff]  ;;  %s277_s21 = scalar_lea.vmem %s196_s1, 32  ;;  %p282_p11 = scmp.lt.s32.totalorder %s196_s1, %s196_s1 }
  0x1f   :  { %215 = vmatprep.subr.mxu0 %v44_v1  ;;  %p278_p10 = scmp.ne.s32.totalorder %s196_s1, %s277_s21  ;;  %p283_p12 = scmp.lt.s32.totalorder %s277_s21, %s277_s21 }
  0x20   :  { %216 = vmatpush3.msra.mxu0 %v44_v1 }
  0x21   :  { %217 = vmatprep.subr.mxu0 %v43_v3  ;;  %p284_p13 = por %p283_p12, %p282_p11 }
  0x22   :  { %218 = vmatpush3.msra.mxu0 %v43_v3 }
  0x23   :  { %219 = vmatprep.subr.mxu0 %v42_v4  ;;  %p285_p0 = pnand %p284_p13, %p278_p10 }
  0x24   :  { %220 = vmatpush3.msra.mxu0 %v42_v4 }
  0x25   :  { %222 = vmatmul.mubr.msk.f32.vlgmr.msra.gmra.mxu0 %vm46_vm0, %v41_v5 }
  0xe5   :  { %v223_v6 = vpop.f32.mrf.mxu0 }
  0xe6   :  { %v135_v7 = vsel %vm46_vm0, %v223_v6, -inf }
  0xe7   :  { %v136_v8 = vrot.slane %v135_v7, 4  ;;  %v119_v9 = vpop.f32.mrf.mxu0 }
  0xe8   :  { %v128_v10 = vsel %vm46_vm0, %v119_v9, -inf }
  0xe9   :  { %v137_v11 = vmax.f32 %v135_v7, %v136_v8  ;;  %v129_v12 = vrot.slane %v128_v10, 4 }
  0xeb   :  { %v138_v13 = vrot.slane %v137_v11, 2  ;;  %v130_v14 = vmax.f32 %v128_v10, %v129_v12 }
  0xed   :  { %v139_v15 = vmax.f32 %v137_v11, %v138_v13  ;;  %v131_v16 = vrot.slane %v130_v14, 2 }
  0xef   :  { %v140_v17 = vrot.slane %v139_v15, 1  ;;  %v132_v18 = vmax.f32 %v130_v14, %v131_v16 }
  0xf1   :  { %v141_v19 = vmax.f32 %v139_v15, %v140_v17  ;;  %v133_v20 = vrot.slane %v132_v18, 1 }
  0xf3   :  { %v143_v21 = vsub.f32 %v223_v6, %v141_v19  ;;  %v134_v22 = vmax.f32 %v132_v18, %v133_v20 }
  0xf5   :  { %v146_v23 = vmul.f32 1.442695, %v143_v21  ;;  %v142_v24 = vsub.f32 %v119_v9, %v134_v22 }
  0xf7   :  { %229 = vpow2.f32 %v146_v23  ;;  %v144_v25 = vmul.f32 1.442695, %v142_v24 }
  0xf9   :  { %231 = vpow2.f32 %v144_v25 }
 0x104   :  { %v230_v26 = vpop.eup %229 }
 0x105   :  { %v155_v27 = vsel %vm46_vm0, %v230_v26, 0.0  ;;  %v163_v28 = vmul.f32 %v230_v26, %v41_v5 }
 0x106   :  { %v232_v29 = vpop.eup %231  ;;  %v156_v30 = vrot.slane %v155_v27, 4 }
 0x107   :  { %v148_v31 = vsel %vm46_vm0, %v232_v29, 0.0  ;;  %v162_v32 = vmul.f32 %v232_v29, %v40_v2  ;;  %v171_v36 = vsel %vm46_vm0, %v163_v28, 0.0 }
 0x108   :  { %v157_v33 = vadd.f32 %v156_v30, %v155_v27  ;;  %v149_v34 = vrot.slane %v148_v31, 4  ;;  %v172_v42 = vrot.slane %v171_v36, 4 }
 0x109   :  { %v164_v35 = vsel %vm46_vm0, %v162_v32, 0.0 }
 0x10a   :  { %v158_v37 = vrot.slane %v157_v33, 2  ;;  %v150_v38 = vadd.f32 %v149_v34, %v148_v31  ;;  %v165_v41 = vrot.slane %v164_v35, 4  ;;  %v173_v48 = vadd.f32 %v172_v42, %v171_v36 }
 0x10c   :  { %v159_v39 = vadd.f32 %v158_v37, %v157_v33  ;;  %v151_v40 = vrot.slane %v150_v38, 2  ;;  %v166_v47 = vadd.f32 %v165_v41, %v164_v35  ;;  %v174_v51 = vrot.slane %v173_v48, 2 }
 0x10e   :  { %v160_v43 = vrot.slane %v159_v39, 1  ;;  %v152_v44 = vadd.f32 %v151_v40, %v150_v38  ;;  %v167_v50 = vrot.slane %v166_v47, 2  ;;  %v175_v53 = vadd.f32 %v174_v51, %v173_v48 }
 0x110   :  { %v161_v45 = vadd.f32 %v160_v43, %v159_v39  ;;  %v153_v46 = vrot.slane %v152_v44, 1  ;;  %v168_v52 = vadd.f32 %v167_v50, %v166_v47  ;;  %v176_v55 = vrot.slane %v175_v53, 1 }
 0x112   :  { %233 = vrcp.f32 %v161_v45  ;;  %v154_v49 = vadd.f32 %v153_v46, %v152_v44  ;;  %v169_v54 = vrot.slane %v168_v52, 1  ;;  %v177_v58 = vadd.f32 %v176_v55, %v175_v53 }
 0x114   :  { %235 = vrcp.f32 %v154_v49  ;;  %v170_v57 = vadd.f32 %v169_v54, %v168_v52 }
 0x11f   :  { %v234_v56 = vpop.eup %233 }
 0x120   :  { %v181_v61 = vmul.f32 %v234_v56, %v177_v58 }
 0x121   :  { %v236_v59 = vpop.eup %235 }
 0x122   :  { %v179_v60 = vmul.f32 %v236_v59, %v170_v57 }
 0x124   :  { %v185_v62 = vsel %vm184_vm1, %v181_v61, %v179_v60 }
 0x125   :  { %188 = vst.msk [vmem:[#allocation7] sm:$0x3] %vm187_vm2, %v185_v62 }
 0x126   :  { %288 = shalt.err (!%p285_p0)
}
 0x127   :  { %198 = dma.vmem_to_hbm [thread:$0]  %s196_s1, 32, %s342_s2, [#allocation4]  }
 0x128   :  { %301 = dma.done.wait [#allocation4], 32  }
 0x129   :  { %302 = vsyncadd [#allocation4], 4294967264 }
 0x12a   :  { %202 = vsyncpa [#allocation3], 1 }
 0x12b   :  { %203 = vsyncpa [#allocation6], 1 }
 0x12c   :  { %204 = vsyncpa [#allocation4], 1 }

</bundles_post_ra>
